<compile_context>
chip_gen: v7x
topology: tpu7x:2x2x1
jax: 0.10.0
libtpu: 0.0.40
codegen_flags: <defaults>
</compile_context>

<pallas_src>
import functools

import jax
import jax.numpy as jnp
from jax.experimental import pallas as pl
from jax.experimental.pallas import tpu as pltpu


_LANE = 1024           # lane-dense last dim of the L1 slab (multiple of 128)
_MAX_TILE_ROWS = 512   # (512, 1024) f32 tile = 2 MiB per buffer
_CORE_SPLITS = 2       # leading "parallel" grid axis for v7x megacore


def _cdiv(a, b):
    return -(-a // b)


# ----------------------------------------------------------------------------
# Fused Pallas kernel
# ----------------------------------------------------------------------------
def _merge_kernel(ps_ref, pt_ref, a_ref, b_ref, o_ref, acc_ref, *, inv_n):
    """Fused CriterionMerge kernel.

    grid = (cores, tiles_per_core); axis 0 "parallel", axis 1 "arbitrary".
    ps_ref / pt_ref : (B, M, C) pooled 'mid' features (C on lanes), resident.
    a_ref  / b_ref  : (TR, LANE) tile of the flattened 'out' predictions.
    o_ref           : (1, 8, 128) per-core partial result (lane-aligned VMEM).
    acc_ref         : SMEM f32[2]  -> [0]=running L1 sum, [1]=pairwise loss.
    """
    c = pl.program_id(0)
    i = pl.program_id(1)
    last = pl.num_programs(1) - 1

    @pl.when(i == 0)
    def _init():
        acc_ref[0] = jnp.float32(0.0)
        acc_ref[1] = jnp.float32(0.0)

    # ---- pairwise similarity loss: tiny, computed once on core 0 while the
    # ---- first L1 tiles are streaming in.
    @pl.when(jnp.logical_and(i == 0, c == 0))
    def _pairwise():
        s = ps_ref[...].astype(jnp.float32)    # (B, M, C)
        t = pt_ref[...].astype(jnp.float32)
        B, M, _ = s.shape

        def gram(x):
            # per spatial position channel-L2 norm (lane reduce), eps after sqrt
            norm = jnp.sqrt(jnp.sum(x * x, axis=-1, keepdims=True)) + 1e-8
            xn = x / norm
            # batched gram: (B, M, C) x (B, M, C) -> (B, M, M), contract channels
            return jnp.einsum('bmc,bnc->bmn', xn, xn,
                              preferred_element_type=jnp.float32)

        diff = gram(t) - gram(s)
        acc_ref[1] = (jnp.sum(diff * diff)
                      / jnp.float32(M * M) / jnp.float32(B))

    # ---- L1 (mean absolute error) partial sum for this tile.
    a = a_ref[...].astype(jnp.float32)
    b = b_ref[...].astype(jnp.float32)
    acc_ref[0] += jnp.sum(jnp.abs(a - b))

    @pl.when(i == last)
    def _finalize():
        part = acc_ref[1] + acc_ref[0] * jnp.float32(inv_n)
        o_ref[...] = jnp.full(o_ref.shape, part, dtype=jnp.float32)


# ----------------------------------------------------------------------------
# Glue (pooling / flattening / call-site)
# ----------------------------------------------------------------------------
def _maxpool_ceil(x, kh, kw):
    """MaxPool2d(kernel=stride=(kh,kw), ceil_mode=True) on NCHW input."""
    # TODO(synk): tiny, non-tile-aligned pooling windows; kept as JAX glue.
    B, C, H, W = x.shape
    Hp, Wp = _cdiv(H, kh), _cdiv(W, kw)
    ph, pw = Hp * kh - H, Wp * kw - W
    if ph or pw:
        x = jnp.pad(x, ((0, 0), (0, 0), (0, ph), (0, pw)),
                    constant_values=-jnp.inf)
    x = x.reshape(B, C, Hp, kh, Wp, kw)
    return jnp.max(x, axis=(3, 5))


@functools.partial(jax.jit, static_argnames=("pairwise_scale",))
def criterion_merge(stu_mid, tea_mid, stu_out, tea_out, pixel_w,
                    pairwise_scale=0.5):
    """Forward pass of CriterionMerge: pixel_w * (l_pair + l_pixel)."""
    B, C, H, W = stu_mid.shape
    kh = int(H * pairwise_scale)   # PyTorch: patch_w = int(shape[2] * scale)
    kw = int(W * pairwise_scale)   # PyTorch: patch_h = int(shape[3] * scale)

    # ---- pooled 'mid' features -> (B, M, C): channel dim on the lane axis.
    ps = _maxpool_ceil(stu_mid, kh, kw)
    pt = _maxpool_ceil(tea_mid, kh, kw)
    Bp, Cp, Hp, Wp = ps.shape
    M = Hp * Wp
    ps = ps.reshape(Bp, Cp, M).transpose(0, 2, 1)
    pt = pt.reshape(Bp, Cp, M).transpose(0, 2, 1)

    # ---- 'out' predictions -> lane-dense 2D slab, tiled over rows.
    n = stu_out.size
    r = _cdiv(n, _LANE)
    tr = min(_MAX_TILE_ROWS, max(8, _cdiv(_cdiv(r, _CORE_SPLITS), 8) * 8))
    tpc = _cdiv(r, _CORE_SPLITS * tr)          # tiles per core
    r_pad = _CORE_SPLITS * tpc * tr
    pad = r_pad * _LANE - n                    # zero pad -> |a-b| == 0 there

    def slab(x):
        x = x.reshape(-1)
        if pad:
            x = jnp.pad(x, (0, pad))
        return x.reshape(r_pad, _LANE)

    a2d = slab(stu_out)   # keep storage dtype; upcast per tile in-kernel
    b2d = slab(tea_out)

    kernel = functools.partial(_merge_kernel, inv_n=1.0 / n)

    out = pl.pallas_call(
        kernel,
        out_shape=jax.ShapeDtypeStruct((_CORE_SPLITS, 8, 128), jnp.float32),
        grid_spec=pltpu.PrefetchScalarGridSpec(
            num_scalar_prefetch=0,
            grid=(_CORE_SPLITS, tpc),
            in_specs=[
                pl.BlockSpec((Bp, M, Cp), lambda c, i: (0, 0, 0)),   # resident
                pl.BlockSpec((Bp, M, Cp), lambda c, i: (0, 0, 0)),   # resident
                pl.BlockSpec((tr, _LANE), lambda c, i: (c * tpc + i, 0)),
                pl.BlockSpec((tr, _LANE), lambda c, i: (c * tpc + i, 0)),
            ],
            out_specs=pl.BlockSpec((1, 8, 128), lambda c, i: (c, 0, 0)),
            scratch_shapes=[pltpu.SMEM((2,), jnp.float32)],
        ),
        compiler_params=pltpu.CompilerParams(
            dimension_semantics=("parallel", "arbitrary"),
            vmem_limit_bytes=32 * 1024 * 1024,
        ),
    )(ps, pt, a2d, b2d)

    # core 0 wrote l_pair + its L1 partial; core 1 wrote its L1 partial.
    l_total = out[:, 0, 0].sum()
    return pixel_w * l_total


# ----------------------------------------------------------------------------
# Pure-JAX reference (mirrors the PyTorch math) for a sanity check.
# ----------------------------------------------------------------------------
def _reference(stu_mid, tea_mid, stu_out, tea_out, pixel_w, scale):
    def similarity(feat):
        feat = feat.astype(jnp.float32)
        norm = jnp.sqrt(jnp.sum(feat ** 2, axis=1, keepdims=True)) + 1e-8
        feat = feat / norm
        B, C, H, W = feat.shape
        feat = feat.reshape(B, C, H * W)
        return jnp.einsum('icm,icn->imn', feat, feat)

    kh = int(stu_mid.shape[2] * scale)
    kw = int(stu_mid.shape[3] * scale)
    ps = _maxpool_ceil(stu_mid, kh, kw)
    pt = _maxpool_ceil(tea_mid, kh, kw)
    M = pt.shape[-1] * pt.shape[-2]
    sim_err = (similarity(pt) - similarity(ps)) ** 2 / (M ** 2) / pt.shape[0]
    l_pair = jnp.sum(sim_err)
    l_pixel = jnp.mean(jnp.abs(stu_out.astype(jnp.float32)
                               - tea_out.astype(jnp.float32)))
    return pixel_w * l_pair + pixel_w * l_pixel


if __name__ == "__main__":
    key = jax.random.PRNGKey(0)
    k1, k2, k3, k4 = jax.random.split(key, 4)

    B, C, H, W = 2, 4, 16, 16          # 'mid' features
    Co, Ho, Wo = 4, 16, 16             # 'out' predictions
    pairwise_scale = 0.5
    pixel_w = jnp.float32(0.7)

    stu_mid = jax.random.normal(k1, (B, C, H, W), dtype=jnp.float32)
    tea_mid = jax.random.normal(k2, (B, C, H, W), dtype=jnp.float32)
    stu_out = jax.random.normal(k3, (B, Co, Ho, Wo), dtype=jnp.float32)
    tea_out = jax.random.normal(k4, (B, Co, Ho, Wo), dtype=jnp.float32)

    loss = criterion_merge(stu_mid, tea_mid, stu_out, tea_out, pixel_w,
                           pairwise_scale=pairwise_scale)
    loss = jax.block_until_ready(loss)

    ref = _reference(stu_mid, tea_mid, stu_out, tea_out, pixel_w,
                     pairwise_scale)
    assert jnp.allclose(loss, ref, rtol=1e-5, atol=1e-5), (loss, ref)

    print("KERNEL_OK")
</pallas_src>

<mosaic_0001>
module attributes {stable_mosaic.version = 11 : i64} {
  func.func @_merge_kernel(%arg0: i32, %arg1: i32, %arg2: memref<2x4x4xf32, #tpu.memory_space<vmem>>, %arg3: memref<2x4x4xf32, #tpu.memory_space<vmem>>, %arg4: memref<8x1024xf32, #tpu.memory_space<vmem>>, %arg5: memref<8x1024xf32, #tpu.memory_space<vmem>>, %arg6: memref<1x8x128xf32, #tpu.memory_space<vmem>>, %arg7: memref<2xf32, #tpu.memory_space<smem>>) attributes {dimension_semantics = [#tpu.dimension_semantics<parallel>, #tpu.dimension_semantics<arbitrary>], iteration_bounds = array<i64: 2, 1>, scalar_prefetch = 0 : i64, scratch_operands = 1 : i64, tpu.core_type = #tpu.core_type<tc>, window_params = [{pipeline_mode = #tpu.pipeline_mode<synchronous>, transform_indices = @transform_0, window_bounds = array<i64: 2, 4, 4>}, {pipeline_mode = #tpu.pipeline_mode<synchronous>, transform_indices = @transform_1, window_bounds = array<i64: 2, 4, 4>}, {transform_indices = @transform_2, window_bounds = array<i64: 8, 1024>}, {transform_indices = @transform_3, window_bounds = array<i64: 8, 1024>}, {transform_indices = @transform_4, window_bounds = array<i64: 1, 8, 128>}]} {
    %c0_i32 = arith.constant 0 : i32
    %0 = arith.cmpi eq, %arg1, %c0_i32 : i32
    %1 = arith.extui %0 : i1 to i32
    %c0_i32_0 = arith.constant 0 : i32
    %2 = arith.cmpi ne, %1, %c0_i32_0 : i32
    scf.if %2 {
      %cst_11 = arith.constant 0.000000e+00 : f32
      %c0_12 = arith.constant 0 : index
      %22 = memref.load %arg7[%c0_12] : memref<2xf32, #tpu.memory_space<smem>>
      memref.store %cst_11, %arg7[%c0_12] : memref<2xf32, #tpu.memory_space<smem>>
      %cst_13 = arith.constant 0.000000e+00 : f32
      %c1 = arith.constant 1 : index
      %23 = memref.load %arg7[%c1] : memref<2xf32, #tpu.memory_space<smem>>
      memref.store %cst_13, %arg7[%c1] : memref<2xf32, #tpu.memory_space<smem>>
    } else {
    }
    %c0_i32_1 = arith.constant 0 : i32
    %3 = arith.cmpi eq, %arg1, %c0_i32_1 : i32
    %c0_i32_2 = arith.constant 0 : i32
    %4 = arith.cmpi eq, %arg0, %c0_i32_2 : i32
    %5 = arith.andi %3, %4 : i1
    %6 = arith.extui %5 : i1 to i32
    %c0_i32_3 = arith.constant 0 : i32
    %7 = arith.cmpi ne, %6, %c0_i32_3 : i32
    scf.if %7 {
      %c0_11 = arith.constant 0 : index
      %c0_12 = arith.constant 0 : index
      %c0_13 = arith.constant 0 : index
      %22 = vector.load %arg2[%c0_11, %c0_12, %c0_13] : memref<2x4x4xf32, #tpu.memory_space<vmem>>, vector<2x4x4xf32>
      %c0_14 = arith.constant 0 : index
      %c0_15 = arith.constant 0 : index
      %c0_16 = arith.constant 0 : index
      %23 = vector.load %arg3[%c0_14, %c0_15, %c0_16] : memref<2x4x4xf32, #tpu.memory_space<vmem>>, vector<2x4x4xf32>
      %24 = arith.mulf %23, %23 : vector<2x4x4xf32>
      %cst_17 = arith.constant dense<0.000000e+00> : vector<2x4xf32>
      %25 = vector.multi_reduction <add>, %24, %cst_17 [2] : vector<2x4x4xf32> to vector<2x4xf32>
      %26 = vector.shape_cast %25 : vector<2x4xf32> to vector<2x4x1xf32>
      %27 = math.sqrt %26 : vector<2x4x1xf32>
      %cst_18 = arith.constant 9.99999993E-9 : f32
      %28 = vector.broadcast %cst_18 : f32 to vector<2x4x1xf32>
      %29 = arith.addf %27, %28 : vector<2x4x1xf32>
      %30 = vector.broadcast %29 : vector<2x4x1xf32> to vector<2x4x4xf32>
      %31 = arith.divf %23, %30 : vector<2x4x4xf32>
      "tpu.trace_start"() <{level = 10 : i32, message = "bmc,bnc->bmn"}> : () -> ()
      %cst_19 = arith.constant dense<0.000000e+00> : vector<2x4x4xf32>
      %32 = tpu.matmul %31, %31, %cst_19 {dimension_numbers = #tpu.dot_dimension_numbers<[2], [2], [1], [1], [0, 0, 0, 1, 1, 1], [0], [0]>} : vector<2x4x4xf32>, vector<2x4x4xf32>, vector<2x4x4xf32> -> vector<2x4x4xf32>
      "tpu.trace_stop"() : () -> ()
      %33 = arith.mulf %22, %22 : vector<2x4x4xf32>
      %cst_20 = arith.constant dense<0.000000e+00> : vector<2x4xf32>
      %34 = vector.multi_reduction <add>, %33, %cst_20 [2] : vector<2x4x4xf32> to vector<2x4xf32>
      %35 = vector.shape_cast %34 : vector<2x4xf32> to vector<2x4x1xf32>
      %36 = math.sqrt %35 : vector<2x4x1xf32>
      %cst_21 = arith.constant 9.99999993E-9 : f32
      %37 = vector.broadcast %cst_21 : f32 to vector<2x4x1xf32>
      %38 = arith.addf %36, %37 : vector<2x4x1xf32>
      %39 = vector.broadcast %38 : vector<2x4x1xf32> to vector<2x4x4xf32>
      %40 = arith.divf %22, %39 : vector<2x4x4xf32>
      "tpu.trace_start"() <{level = 10 : i32, message = "bmc,bnc->bmn"}> : () -> ()
      %cst_22 = arith.constant dense<0.000000e+00> : vector<2x4x4xf32>
      %41 = tpu.matmul %40, %40, %cst_22 {dimension_numbers = #tpu.dot_dimension_numbers<[2], [2], [1], [1], [0, 0, 0, 1, 1, 1], [0], [0]>} : vector<2x4x4xf32>, vector<2x4x4xf32>, vector<2x4x4xf32> -> vector<2x4x4xf32>
      "tpu.trace_stop"() : () -> ()
      %42 = arith.subf %32, %41 : vector<2x4x4xf32>
      %43 = arith.mulf %42, %42 : vector<2x4x4xf32>
      %44 = vector.shape_cast %43 : vector<2x4x4xf32> to vector<1x2x4x4xf32>
      %cst_23 = arith.constant dense<0.000000e+00> : vector<1xf32>
      %45 = vector.multi_reduction <add>, %44, %cst_23 [1, 2, 3] : vector<1x2x4x4xf32> to vector<1xf32>
      %46 = vector.shape_cast %45 : vector<1xf32> to vector<1x1x1x1xf32>
      %47 = vector.extract %46[0, 0, 0, 0] : f32 from vector<1x1x1x1xf32>
      %cst_24 = arith.constant 1.600000e+01 : f32
      %48 = arith.divf %47, %cst_24 : f32
      %cst_25 = arith.constant 2.000000e+00 : f32
      %49 = arith.divf %48, %cst_25 : f32
      %c1 = arith.constant 1 : index
      %50 = memref.load %arg7[%c1] : memref<2xf32, #tpu.memory_space<smem>>
      memref.store %49, %arg7[%c1] : memref<2xf32, #tpu.memory_space<smem>>
    } else {
    }
    %c0 = arith.constant 0 : index
    %c0_4 = arith.constant 0 : index
    %8 = vector.load %arg4[%c0, %c0_4] : memref<8x1024xf32, #tpu.memory_space<vmem>>, vector<8x1024xf32>
    %c0_5 = arith.constant 0 : index
    %c0_6 = arith.constant 0 : index
    %9 = vector.load %arg5[%c0_5, %c0_6] : memref<8x1024xf32, #tpu.memory_space<vmem>>, vector<8x1024xf32>
    %c0_7 = arith.constant 0 : index
    %10 = memref.load %arg7[%c0_7] : memref<2xf32, #tpu.memory_space<smem>>
    %11 = arith.subf %8, %9 : vector<8x1024xf32>
    %12 = math.absf %11 : vector<8x1024xf32>
    %13 = vector.shape_cast %12 : vector<8x1024xf32> to vector<1x8x1024xf32>
    %cst = arith.constant dense<0.000000e+00> : vector<1xf32>
    %14 = vector.multi_reduction <add>, %13, %cst [1, 2] : vector<1x8x1024xf32> to vector<1xf32>
    %15 = vector.shape_cast %14 : vector<1xf32> to vector<1x1x1xf32>
    %16 = vector.extract %15[0, 0, 0] : f32 from vector<1x1x1xf32>
    %17 = arith.addf %10, %16 : f32
    %c0_8 = arith.constant 0 : index
    %18 = memref.load %arg7[%c0_8] : memref<2xf32, #tpu.memory_space<smem>>
    memref.store %17, %arg7[%c0_8] : memref<2xf32, #tpu.memory_space<smem>>
    %c0_i32_9 = arith.constant 0 : i32
    %19 = arith.cmpi eq, %arg1, %c0_i32_9 : i32
    %20 = arith.extui %19 : i1 to i32
    %c0_i32_10 = arith.constant 0 : i32
    %21 = arith.cmpi ne, %20, %c0_i32_10 : i32
    scf.if %21 {
      %c1 = arith.constant 1 : index
      %22 = memref.load %arg7[%c1] : memref<2xf32, #tpu.memory_space<smem>>
      %c0_11 = arith.constant 0 : index
      %23 = memref.load %arg7[%c0_11] : memref<2xf32, #tpu.memory_space<smem>>
      %cst_12 = arith.constant 4.8828125E-4 : f32
      %24 = arith.mulf %23, %cst_12 : f32
      %25 = arith.addf %22, %24 : f32
      %26 = vector.broadcast %25 : f32 to vector<1x8x128xf32>
      %c0_13 = arith.constant 0 : index
      %c0_14 = arith.constant 0 : index
      %c0_15 = arith.constant 0 : index
      %27 = vector.load %arg6[%c0_13, %c0_14, %c0_15] : memref<1x8x128xf32, #tpu.memory_space<vmem>>, vector<1x8x128xf32>
      tpu.vector_store %arg6[%c0_13, %c0_14, %c0_15], %26 {strides = array<i32>} : memref<1x8x128xf32, #tpu.memory_space<vmem>>, vector<1x8x128xf32>,
    } else {
    }
    return
  }
  func.func @transform_0(%arg0: i32, %arg1: i32) -> (i32, i32, i32) {
    %c0_i32 = arith.constant 0 : i32
    %c0_i32_0 = arith.constant 0 : i32
    %c0_i32_1 = arith.constant 0 : i32
    %c0_i32_2 = arith.constant 0 : i32
    return %c0_i32, %c0_i32_0, %c0_i32_1 : i32, i32, i32
  }
  func.func @transform_1(%arg0: i32, %arg1: i32) -> (i32, i32, i32) {
    %c0_i32 = arith.constant 0 : i32
    %c0_i32_0 = arith.constant 0 : i32
    %c0_i32_1 = arith.constant 0 : i32
    %c0_i32_2 = arith.constant 0 : i32
    return %c0_i32, %c0_i32_0, %c0_i32_1 : i32, i32, i32
  }
  func.func @transform_2(%arg0: i32, %arg1: i32) -> (i32, i32) {
    %c1_i32 = arith.constant 1 : i32
    %0 = arith.muli %arg0, %c1_i32 : i32
    %1 = arith.addi %0, %arg1 : i32
    %c0_i32 = arith.constant 0 : i32
    %c0_i32_0 = arith.constant 0 : i32
    return %1, %c0_i32 : i32, i32
  }
  func.func @transform_3(%arg0: i32, %arg1: i32) -> (i32, i32) {
    %c1_i32 = arith.constant 1 : i32
    %0 = arith.muli %arg0, %c1_i32 : i32
    %1 = arith.addi %0, %arg1 : i32
    %c0_i32 = arith.constant 0 : i32
    %c0_i32_0 = arith.constant 0 : i32
    return %1, %c0_i32 : i32, i32
  }
  func.func @transform_4(%arg0: i32, %arg1: i32) -> (i32, i32, i32) {
    %c0_i32 = arith.constant 0 : i32
    %c0_i32_0 = arith.constant 0 : i32
    %c0_i32_1 = arith.constant 0 : i32
    return %arg0, %c0_i32, %c0_i32_0 : i32, i32, i32
  }
}

</mosaic_0001>

<bundles_post_ra>
// kernel: criterion_merge.1
= control target key start
LH: loop header
LB: loop body
LE: loop exit
PB: predicated region body
PF: predicated region fallthrough
CT: control target
= control target key end

     0   :  { %s919_s15 = smov 0   ;;  %s921_s16 = smov 0   ;;  %s1036_s0 = inlined_call_operand.vmem [shape: f32[2,4,4], index: 0, kind: input, shape index: {}]   ;;  %s1037_s1 = inlined_call_operand.vmem [shape: f32[2,4,4], index: 1, kind: input, shape index: {}]   ;;  %s1038_s2 = inlined_call_operand.vmem [shape: f32[16,1024], index: 2, kind: input, shape index: {}]   ;;  %s1039_s3 = inlined_call_operand.vmem [shape: f32[16,1024], index: 3, kind: input, shape index: {}]   ;;  %s1040_s4 = inlined_call_operand.vmem [shape: f32[2,8,128], index: 4, kind: output, shape index: {}]  }
   0x1   :  { %s923_s17 = smov 0  }
   0x2 LB: > { %s26_s18 = sadd.s32 1, %s885_s16  ;;  %p771_p0 = scmp.ge.s32.totalorder %s889_s17, 1  ;;  %s889_s17 = sphi %s923_s17, %s14_s17   ;;  %s885_s16 = sphi %s921_s16, %s1042_s16   ;;  %s881_s15 = sphi %s919_s15, %s1041_s15  }
   0x3   : > { %p28_p1 = scmp.ge.s32.totalorder %s26_s18, 2  ;;  %p192_p2 = scmp.lt.s32.totalorder %s889_s17, 3 }
   0x5   : > { %s1044_s18 = smov (%p28_p1, %s26_s18), 0  ;;  %p193_p3 = pnand %p771_p0, %p192_p2 }
   0x6   : > { %p225_p4 = scmp.lt.s32.totalorder (!%p193_p3), %s881_s15, 1  ;;  %s891_s19 = smov (!%p193_p3), 0.0  }
   0x7   : > { %196 = sbr.rel (%p193_p3) target bundleno = 863 (0x35f), region = 36  ;;  %247 = sst [smem:[#allocation2]] (!%p193_p3), %s891_s19 }
   0x8   : > { %p250_p5 = scmp.eq.s32.totalorder (!%p193_p3), %s881_s15, 0  ;;  %249 = sst [smem:[#allocation2 + $0x1]] (!%p193_p3), %s891_s19 }
   0xe   : > { %s1046_s15 = smov (!%p225_p4, %s881_s15), 1  ;;  %254 = sbr.rel (!%p250_p5) target bundleno = 630 (0x276), region = 44 }
   0xf   : > { %s789_s20 = sshll.u32 %s1046_s15, 6  ;;  %s776_s21 = sshll.u32 %s1046_s15, 3  ;;  %v955_v0 = vld [vmem:[%s1037_s1] sm:$0xf] (%p250_p5)  ;;  %vm261_vm0 = vcmask (%p250_p5), 27648   ;;  %v892_v12 = vmov (%p250_p5), 0.0  }
  0x10   : > { %s940_s24 = scalar_lea.vmem %s1038_s2, %s789_s20  ;;  %s945_s27 = scalar_lea.vmem %s1039_s3, %s789_s20  ;;  %v960_v1 = vld [vmem:[%s1036_s0] sm:$0xf] (%p250_p5)  ;;  %v259_v2 = vmul.f32 (%p250_p5), %v955_v0, %v955_v0  ;;  %v969_v4 = vld [vmem:[%s1037_s1 + $0x4] sm:$0xf] (%p250_p5)  ;;  %800 = vmatprep.subr.mxu0 (%p250_p5), %v892_v12  ;;  %805 = vmatprep.subr.mxu1 (%p250_p5), %v892_v12  ;;  %vm893_vm1 = vmmov (%p250_p5), 0   ;;  %vm288_vm10 = vcmask (%p250_p5), 31744  }
  0x11   : > { %s950_s30 = scalar_lea.vmem %s1040_s4, %s776_s21  ;;  %v435_v3 = vmul.f32 (%p250_p5), %v960_v1, %v960_v1  ;;  %v974_v5 = vld [vmem:[%s1036_s0 + $0x4] sm:$0xf] (%p250_p5)  ;;  %v260_v6 = vmul.f32 (%p250_p5), %v969_v4, %v969_v4  ;;  %802 = vmatprep.mubr.msk.f32.mxu0 (%p250_p5), %vm893_vm1, %v892_v12  ;;  %807 = vmatprep.mubr.msk.f32.mxu1 (%p250_p5), %vm893_vm1, %v892_v12 }
  0x12   : > { %v436_v7 = vmul.f32 (%p250_p5), %v974_v5, %v974_v5  ;;  %v262_v8 = vsel (%p250_p5), %vm261_vm0, %v259_v2, 0.0 }
  0x13   : > { %v437_v9 = vsel (%p250_p5), %vm261_vm0, %v435_v3, 0.0  ;;  %263 = vadd.xlane.f32.xlu0 (%p250_p5), %v262_v8  ;;  %v265_v10 = vsel (%p250_p5), %vm261_vm0, %v260_v6, 0.0 }
  0x14   : > { %438 = vadd.xlane.f32.xlu1 (%p250_p5), %v437_v9  ;;  %v440_v11 = vsel (%p250_p5), %vm261_vm0, %v436_v7, 0.0 }
  0x17   : > { %266 = vadd.xlane.f32.xlu0 %v265_v10 }
  0x18   : > { %441 = vadd.xlane.f32.xlu1 %v440_v11 }
  0xa0   : > { %v264_v13 = vpop.xlane.xlu0 %263 }
  0xa1   : > { %v439_v14 = vpop.xlane.xlu1 %438  ;;  %851 = vrsqrt.f32 %v264_v13  ;;  %vm270_vm2 = vcmp.eq.f32.partialorder %v264_v13, inf  ;;  %v273_v20 = vand.u32 2147483648, %v264_v13  ;;  %vm272_vm3 = vcmp.eq.f32.partialorder %v264_v13, 0.0 }
  0xa2   : > { %853 = vrsqrt.f32 %v439_v14  ;;  %vm445_vm4 = vcmp.eq.f32.partialorder %v439_v14, inf  ;;  %v448_v23 = vand.u32 2147483648, %v439_v14  ;;  %vm447_vm5 = vcmp.eq.f32.partialorder %v439_v14, 0.0 }
  0xa4   : > { %v267_v15 = vpop.xlane.xlu0 %266 }
  0xa5   : > { %v442_v16 = vpop.xlane.xlu1 %441  ;;  %855 = vrsqrt.f32 %v267_v15  ;;  %vm277_vm6 = vcmp.eq.f32.partialorder %v267_v15, inf  ;;  %vm279_vm7 = vcmp.eq.f32.partialorder %v267_v15, 0.0  ;;  %v280_v32 = vand.u32 2147483648, %v267_v15 }
  0xa6   : > { %857 = vrsqrt.f32 %v442_v16  ;;  %vm452_vm8 = vcmp.eq.f32.partialorder %v442_v16, inf  ;;  %v455_v35 = vand.u32 2147483648, %v442_v16  ;;  %vm454_vm9 = vcmp.eq.f32.partialorder %v442_v16, 0.0 }
  0xab   : > { %v852_v17 = vpop.eup %851 }
  0xac   : > { %v854_v18 = vpop.eup %853  ;;  %v269_v19 = vmul.f32 %v852_v17, %v264_v13 }
  0xad   : > { %v444_v21 = vmul.f32 %v854_v18, %v439_v14 }
  0xae   : > { %v271_v22 = vsel %vm270_vm2, %v264_v13, %v269_v19 }
  0xaf   : > { %v856_v24 = vpop.eup %855  ;;  %v274_v25 = vsel %vm272_vm3, %v273_v20, %v271_v22  ;;  %v446_v26 = vsel %vm445_vm4, %v439_v14, %v444_v21 }
  0xb0   : > { %v858_v27 = vpop.eup %857  ;;  %v282_v28 = vadd.f32 1e-08, %v274_v25  ;;  %v449_v29 = vsel %vm447_vm5, %v448_v23, %v446_v26  ;;  %v276_v30 = vmul.f32 %v856_v24, %v267_v15 }
  0xb1   : > { %v457_v31 = vadd.f32 1e-08, %v449_v29  ;;  %v451_v33 = vmul.f32 %v858_v27, %v442_v16 }
  0xb2   : > { %859 = vrcp.f32 %v282_v28  ;;  %v278_v34 = vsel %vm277_vm6, %v267_v15, %v276_v30 }
  0xb3   : > { %v281_v36 = vsel %vm279_vm7, %v280_v32, %v278_v34  ;;  %v453_v37 = vsel %vm452_vm8, %v442_v16, %v451_v33  ;;  %861 = vrcp.f32 %v457_v31 }
  0xb4   : > { %v283_v38 = vadd.f32 1e-08, %v281_v36  ;;  %v456_v39 = vsel %vm454_vm9, %v455_v35, %v453_v37 }
  0xb5   : > { %v458_v40 = vadd.f32 1e-08, %v456_v39 }
  0xb6   : > { %863 = vrcp.f32 %v283_v38 }
  0xb7   : > { %865 = vrcp.f32 %v458_v40 }
  0xbc   : > { %v860_v41 = vpop.eup %859 }
  0xbd   : > { %v285_v42 = vmul.f32 %v860_v41, %v955_v0  ;;  %v862_v43 = vpop.eup %861 }
  0xbe   : > { %v460_v46 = vmul.f32 %v862_v43, %v960_v1 }
  0xbf   : > { %801 = vmatpush3.xpose.msk.msra.mxu0 %vm288_vm10, %v285_v42 }
  0xc0   : > { %v864_v44 = vpop.eup %863  ;;  %810 = vmatprep.subr.mxu0 %v892_v12 }
  0xc1   : > { %v287_v45 = vmul.f32 %v864_v44, %v969_v4  ;;  %v866_v47 = vpop.eup %865 }
  0xc2   : > { %803 = vmatmul.mubr.msk.f32.vlgmr.msra.gmra.mrb[0].mxu0 %vm288_vm10, %v285_v42  ;;  %v462_v48 = vmul.f32 %v866_v47, %v974_v5 }
  0xc3   : > { %806 = vmatpush3.xpose.msk.msra.mxu1 %vm288_vm10, %v287_v45  ;;  %811 = vmatpush3.xpose.msk.msra.mxu0 %vm288_vm10, %v460_v46 }
  0xc4   : > { %812 = vmatprep.mubr.msk.f32.mxu0 %vm893_vm1, %v892_v12  ;;  %815 = vmatprep.subr.mxu1 %v892_v12 }
  0xc6   : > { %808 = vmatmul.mubr.msk.f32.vlgmr.msra.gmra.mrb[0].mxu1 %vm288_vm10, %v287_v45  ;;  %813 = vmatmul.mubr.msk.f32.vlgmr.msra.gmra.mrb[2].mxu0 %vm288_vm10, %v460_v46 }
  0xc7   : > { %816 = vmatpush3.xpose.msk.msra.mxu1 %vm288_vm10, %v462_v48  ;;  %817 = vmatprep.mubr.msk.f32.mxu1 %vm893_vm1, %v892_v12 }
  0xca   : > { %818 = vmatmul.mubr.msk.f32.vlgmr.msra.gmra.mrb[2].mxu1 %vm288_vm10, %v462_v48 }
 0x195   : > { %v358_v49 = vpop.f32.mrb[0].mxu0 }
 0x196   : > { %v804_v50 = vpop.f32.mrb[1].mxu0 }
 0x199   : > { %v431_v51 = vpop.f32.mrb[0].mxu1  ;;  %v532_v52 = vpop.f32.mrb[2].mxu0 }
 0x19a   : > { %v609_v53 = vsub.f32 %v358_v49, %v532_v52  ;;  %v809_v54 = vpop.f32.mrb[1].mxu1  ;;  %v814_v55 = vpop.f32.mrb[3].mxu0 }
 0x19c   : > { %v611_v57 = vmul.f32 %v609_v53, %v609_v53 }
 0x19d   : > { %v605_v56 = vpop.f32.mrb[2].mxu1 }
 0x19e   : > { %v610_v58 = vsub.f32 %v431_v51, %v605_v56  ;;  %v819_v59 = vpop.f32.mrb[3].mxu1  ;;  %v613_v61 = vsel %vm261_vm0, %v611_v57, 0.0 }
 0x1a0   : > { %v612_v60 = vmul.f32 %v610_v58, %v610_v58 }
 0x1a2   : > { %v614_v62 = vsel %vm261_vm0, %v612_v60, 0.0 }
 0x1a3   : > { %v615_v63 = vadd.f32 %v614_v62, %v613_v61 }
 0x1a5   : > { %616 = vadd.xlane.f32.xlu0 %v615_v63 }
 0x232   : > { %v617_v0 = vpop.xlane.xlu0 %616 }
 0x233   : > { %v618_v1 = vrot.slane %v617_v0, 4 }
 0x235   : > { %v619_v2 = vadd.f32 %v618_v1, %v617_v0 }
 0x237   : > { %v620_v3 = vrot.slane %v619_v2, 2 }
 0x239   : > { %v621_v4 = vadd.f32 %v620_v3, %v619_v2 }
 0x23b   : > { %v622_v5 = vrot.slane %v621_v4, 1 }
 0x23d   : > { %v623_v6 = vadd.f32 %v622_v5, %v621_v4 }
 0x23f   : > { %820 = vpush %v623_v6 }
 0x270   : > { %s821_s13 = spop %820 }
 0x271   : > { %s627_s14 = smul.f32 0.0625, %s821_s13 }
 0x273   : > { %s630_s15 = smul.f32 0.5, %s627_s14 }
 0x275   : > { %632 = sst [smem:[#allocation2 + $0x1]] %s630_s15 }
 0x276 PF: > { %v633_v7 = vld [vmem:[%s940_s24] sm:$0xff]  ;;  %v634_v8 = vld [vmem:[%s940_s24 + $0x8] sm:$0xff]  ;;  %v635_v9 = vld [vmem:[%s940_s24 + $0x10] sm:$0xff]  ;;  %s649_s19 = sld [smem:[#allocation2]]  ;;  %s786_s20 = sld [smem:[#allocation2 + $0x1]] }
 0x277   : > { %v636_v10 = vld [vmem:[%s940_s24 + $0x18] sm:$0xff]  ;;  %v637_v11 = vld [vmem:[%s940_s24 + $0x20] sm:$0xff]  ;;  %v642_v13 = vld [vmem:[%s945_s27 + $0x8] sm:$0xff] }
 0x278   : > { %v641_v12 = vld [vmem:[%s945_s27] sm:$0xff]  ;;  %v643_v14 = vld [vmem:[%s945_s27 + $0x10] sm:$0xff]  ;;  %v644_v15 = vld [vmem:[%s945_s27 + $0x18] sm:$0xff]  ;;  %v651_v18 = vsub.f32 %v634_v8, %v642_v13 }
 0x279   : > { %v650_v16 = vsub.f32 %v633_v7, %v641_v12  ;;  %v645_v17 = vld [vmem:[%s945_s27 + $0x20] sm:$0xff]  ;;  %v652_v19 = vsub.f32 %v635_v9, %v643_v14  ;;  %v653_v20 = vsub.f32 %v636_v10, %v644_v15  ;;  %v638_v21 = vld [vmem:[%s940_s24 + $0x28] sm:$0xff]  ;;  %v639_v27 = vld [vmem:[%s940_s24 + $0x30] sm:$0xff] }
 0x27a   : > { %v646_v22 = vld [vmem:[%s945_s27 + $0x28] sm:$0xff]  ;;  %v654_v24 = vsub.f32 %v637_v11, %v645_v17  ;;  %v659_v25 = vand.u32 2147483647, %v651_v18  ;;  %v647_v28 = vld [vmem:[%s945_s27 + $0x30] sm:$0xff]  ;;  %v640_v32 = vld [vmem:[%s940_s24 + $0x38] sm:$0xff] }
 0x27b   : > { %v658_v23 = vand.u32 2147483647, %v650_v16  ;;  %v660_v26 = vand.u32 2147483647, %v652_v19  ;;  %v655_v29 = vsub.f32 %v638_v21, %v646_v22  ;;  %v661_v30 = vand.u32 2147483647, %v653_v20 }
 0x27c   : > { %v648_v33 = vld [vmem:[%s945_s27 + $0x38] sm:$0xff]  ;;  %v656_v34 = vsub.f32 %v639_v27, %v647_v28  ;;  %v662_v35 = vand.u32 2147483647, %v654_v24 }
 0x27d   : > { %v666_v31 = vadd.f32 %v659_v25, %v658_v23  ;;  %v657_v37 = vsub.f32 %v640_v32, %v648_v33  ;;  %v663_v38 = vand.u32 2147483647, %v655_v29 }
 0x27e   : > { %v664_v40 = vand.u32 2147483647, %v656_v34 }
 0x27f   : > { %v667_v36 = vadd.f32 %v666_v31, %v660_v26  ;;  %v665_v42 = vand.u32 2147483647, %v657_v37 }
 0x281   : > { %v668_v39 = vadd.f32 %v667_v36, %v661_v30 }
 0x283   : > { %v669_v41 = vadd.f32 %v668_v39, %v662_v35 }
 0x285   : > { %v670_v43 = vadd.f32 %v669_v41, %v663_v38 }
 0x287   : > { %v671_v44 = vadd.f32 %v670_v43, %v664_v40 }
 0x289   : > { %v672_v45 = vadd.f32 %v671_v44, %v665_v42 }
 0x28b   : > { %673 = vadd.xlane.f32.xlu0 %v672_v45 }
 0x318   : > { %v674_v46 = vpop.xlane.xlu0 %673 }
 0x319   : > { %v675_v47 = vrot.slane %v674_v46, 4 }
 0x31b   : > { %v676_v48 = vadd.f32 %v675_v47, %v674_v46 }
 0x31d   : > { %v677_v49 = vrot.slane %v676_v48, 2 }
 0x31f   : > { %v678_v50 = vadd.f32 %v677_v49, %v676_v48 }
 0x321   : > { %v679_v51 = vrot.slane %v678_v50, 1 }
 0x323   : > { %v680_v52 = vadd.f32 %v679_v51, %v678_v50 }
 0x325   : > { %822 = vpush %v680_v52 }
 0x356   : > { %s823_s21 = spop %822 }
 0x357   : > { %s682_s22 = sadd.f32 %s823_s21, %s649_s19 }
 0x359   : > { %684 = sst [smem:[#allocation2]] %s682_s22  ;;  %s690_s23 = smul.f32 0.00048828125, %s682_s22 }
 0x35b   : > { %s691_s24 = sadd.f32 %s786_s20, %s690_s23 }
 0x35d   : > { %v692_v53 = vstv %s691_s24 }
 0x35e   : > { %693 = vst [vmem:[%s950_s30] sm:$0xff] %v692_v53 }
 0x35f PF: > { %s14_s17 = sadd.s32 1, %s889_s17   ;;  %s1041_s15 = smov %s885_s16 }
 0x360   : > { %p11_p6 = scmp.ge.s32.totalorder %s14_s17, 4   ;;  %s1042_s16 = smov %s1044_s18 }
 0x362   :  { %13 = sbr.rel (!%p11_p6) target bundleno = 2 (0x2), region = 85 }

</bundles_post_ra>
